<compile_context>
chip_gen: v7x
topology: tpu7x:2x2x1
jax: 0.10.0
libtpu: 0.0.40
codegen_flags: <defaults>
</compile_context>

<pallas_src>
import functools

import jax
import jax.numpy as jnp
import numpy as np
from jax.experimental import pallas as pl
from jax.experimental.pallas import tpu as pltpu

FPAD = 128  # lane-dense padded feature / class width


def _gcn15_fused_kernel(x_ref, adj_ref, w_ref, b_ref, o_ref, h_ref,
                        *, num_layers, nclass, in_pad):
    """One grid step == one GraphConvolution layer.

    h_{k+1} = relu(adj @ (h_k @ W_k) + b_k) for k < L-1,
    out     = log_softmax(adj @ (h @ W_L) + b_L) over the first nclass lanes.

    Activations live in a f32 VMEM scratch (N, 128); W/adj are bf16 MXU
    operands with f32 accumulation; bias-add / ReLU / softmax math stay f32.
    """
    k = pl.program_id(0)

    @pl.when(k == 0)
    def _():
        h_ref[...] = x_ref[...]                       # seed the carried activation

    h = h_ref[...]                                    # (N, 128) f32
    w = w_ref[0]                                      # (in_pad, 128) bf16
    b = b_ref[0]                                      # (1, 128) f32
    adj = adj_ref[...]                                # (N, N) bf16

    # First matmul: contraction over the (unpadded-to-128) feature dim.
    lhs = h[:, :in_pad].astype(jnp.bfloat16)          # (N, in_pad) bf16
    support = jnp.dot(lhs, w, preferred_element_type=jnp.float32)        # MXU
    # Second matmul: neighbor aggregation.
    out = jnp.dot(adj, support.astype(jnp.bfloat16),
                  preferred_element_type=jnp.float32)                    # MXU
    out = out + b                                     # f32 bias add

    @pl.when(k < num_layers - 1)
    def _():
        h_ref[...] = jnp.maximum(out, 0.0)            # ReLU (padded lanes stay 0)

    @pl.when(k == num_layers - 1)
    def _():
        # Masked, numerically-stable log_softmax over the valid class lanes.
        lane = jax.lax.broadcasted_iota(jnp.int32, out.shape, 1)
        valid = lane < nclass
        masked = jnp.where(valid, out, jnp.float32(-1e30))
        m = jnp.max(masked, axis=1, keepdims=True)
        s = masked - m
        e = jnp.where(valid, jnp.exp(s), 0.0)
        lse = jnp.log(jnp.sum(e, axis=1, keepdims=True))
        o_ref[...] = jnp.where(valid, s - lse, 0.0).astype(o_ref.dtype)


def _pad2(a, rows, cols):
    r, c = a.shape
    return jnp.pad(a, ((0, rows - r), (0, cols - c)))


def pack_inputs(x, adj, params):
    """One-time packing (hoisted out of the hot path): lane/sublane padding and
    dtype conversion of x / adj / weights / biases."""
    n = x.shape[0]
    in_max = max(w.shape[0] for w, _ in params)
    in_pad = int(np.ceil(in_max / 16) * 16)           # bf16 sublane multiple
    assert in_pad <= FPAD and all(w.shape[1] <= FPAD for w, _ in params)

    x_p = _pad2(x.astype(jnp.float32), n, FPAD)                           # (N,128) f32
    adj_b = adj.astype(jnp.bfloat16)                                      # (N,N)  bf16
    w_p = jnp.stack([_pad2(w.astype(jnp.bfloat16), in_pad, FPAD)
                     for w, _ in params])                                 # (L,32,128) bf16
    b_p = jnp.stack([_pad2(b.astype(jnp.float32).reshape(1, -1), 1, FPAD)
                     for _, b in params])                                 # (L,1,128) f32
    return x_p, adj_b, w_p, b_p


@functools.partial(jax.jit, static_argnames=("nclass",))
def gcn15_forward(x_p, adj_b, w_p, b_p, *, nclass):
    """Runs the whole GCN15 forward pass (eval mode) in a single pallas_call.
    Expects pre-packed inputs from pack_inputs(). Returns (N, nclass) log-probs."""
    n = x_p.shape[0]
    num_layers, in_pad, _ = w_p.shape

    flops = num_layers * (2 * n * in_pad * FPAD + 2 * n * n * FPAD)
    bytes_accessed = (4 * x_p.size + 2 * adj_b.size + 2 * w_p.size
                      + 4 * b_p.size + 4 * n * FPAD)

    kernel = functools.partial(_gcn15_fused_kernel, num_layers=num_layers,
                               nclass=nclass, in_pad=in_pad)

    out_padded = pl.pallas_call(
        kernel,
        out_shape=jax.ShapeDtypeStruct((n, FPAD), jnp.float32),
        grid_spec=pltpu.PrefetchScalarGridSpec(
            num_scalar_prefetch=0,
            grid=(num_layers,),
            in_specs=[
                pl.BlockSpec((n, FPAD), lambda k: (0, 0)),            # x: resident
                pl.BlockSpec((n, n), lambda k: (0, 0)),               # adj: resident
                pl.BlockSpec((1, in_pad, FPAD), lambda k: (k, 0, 0)),  # W_k: streamed
                pl.BlockSpec((1, 1, FPAD), lambda k: (k, 0, 0)),       # b_k: streamed
            ],
            out_specs=pl.BlockSpec((n, FPAD), lambda k: (0, 0)),
            scratch_shapes=[pltpu.VMEM((n, FPAD), jnp.float32)],      # carried h
        ),
        compiler_params=pltpu.CompilerParams(
            dimension_semantics=("arbitrary",)),                       # layers are serial
        cost_estimate=pl.CostEstimate(flops=flops,
                                      transcendentals=n * (nclass + 1),
                                      bytes_accessed=bytes_accessed),
    )(x_p, adj_b, w_p, b_p)
    return out_padded[:, :nclass]


def init_params(key, nfeat, nhid, nclass, num_layers=15):
    """Mirror pygcn GraphConvolution.reset_parameters:
    stdv = 1/sqrt(out_features); W, b ~ U(-stdv, stdv)."""
    params = []
    for k in range(num_layers):
        in_dim = nfeat if k == 0 else nhid
        out_dim = nclass if k == num_layers - 1 else nhid
        key, kw, kb = jax.random.split(key, 3)
        stdv = 1.0 / (out_dim ** 0.5)
        w = jax.random.uniform(kw, (in_dim, out_dim), jnp.float32, -stdv, stdv)
        b = jax.random.uniform(kb, (out_dim,), jnp.float32, -stdv, stdv)
        params.append((w, b))
    return params


def reference_forward(x, adj, params):
    """Pure-JAX f32 reference replicating GCN15.forward in eval mode."""
    h = x
    for i, (w, b) in enumerate(params):
        out = adj @ (h @ w) + b
        if i < len(params) - 1:
            h = jax.nn.relu(out)
        else:
            h = jax.nn.log_softmax(out, axis=1)  # dropout before gc15 is identity in eval
    return h


if __name__ == "__main__":
    # Small shapes consistent with the module.
    N, nfeat, nhid, nclass = 32, 16, 32, 8
    dropout = 0.5  # eval mode => identity

    key = jax.random.PRNGKey(0)
    key, kx, ka = jax.random.split(key, 3)

    x = jax.random.normal(kx, (N, nfeat), jnp.float32)

    # Deterministic dense "adjacency": sparse nonneg + self loops, row-normalized.
    a = jax.random.uniform(ka, (N, N), jnp.float32)
    a = (a > 0.7).astype(jnp.float32) + jnp.eye(N, dtype=jnp.float32)
    adj = a / jnp.sum(a, axis=1, keepdims=True)

    params = init_params(jax.random.PRNGKey(42), nfeat, nhid, nclass)

    # One-time packing (outside the hot path), then the fused kernel call.
    x_p, adj_b, w_p, b_p = pack_inputs(x, adj, params)
    out = gcn15_forward(x_p, adj_b, w_p, b_p, nclass=nclass)
    out = jax.block_until_ready(out)

    assert out.shape == (N, nclass), out.shape
    # Sanity 1: rows of log_softmax exponentiate+sum to ~1.
    row_sums = jnp.sum(jnp.exp(out), axis=1)
    assert bool(jnp.all(jnp.abs(row_sums - 1.0) < 1e-3)), "softmax rows not normalized"
    # Sanity 2: matches pure-JAX f32 reference of the PyTorch forward
    # (bf16 MXU operands with f32 accumulation; adj is row-normalized so the
    # 15-layer error stays well inside the 1e-2 budget).
    ref = jax.block_until_ready(reference_forward(x, adj, params))
    max_err = float(jnp.max(jnp.abs(out - ref)))
    assert np.isfinite(max_err) and max_err < 1e-2, f"mismatch vs reference: {max_err}"

    print("KERNEL_OK")
</pallas_src>

<mosaic_0001>
module attributes {stable_mosaic.version = 11 : i64} {
  func.func @_gcn15_fused_kernel(%arg0: i32, %arg1: memref<32x128xf32, #tpu.memory_space<vmem>>, %arg2: memref<32x32xbf16, #tpu.memory_space<vmem>>, %arg3: memref<1x32x128xbf16, #tpu.memory_space<vmem>>, %arg4: memref<1x1x128xf32, #tpu.memory_space<vmem>>, %arg5: memref<32x128xf32, #tpu.memory_space<vmem>>, %arg6: memref<32x128xf32, #tpu.memory_space<vmem>>) attributes {dimension_semantics = [#tpu.dimension_semantics<arbitrary>], iteration_bounds = array<i64: 15>, scalar_prefetch = 0 : i64, scratch_operands = 1 : i64, tpu.core_type = #tpu.core_type<tc>, window_params = [{pipeline_mode = #tpu.pipeline_mode<synchronous>, transform_indices = @transform_0, window_bounds = array<i64: 32, 128>}, {pipeline_mode = #tpu.pipeline_mode<synchronous>, transform_indices = @transform_1, window_bounds = array<i64: 32, 32>}, {transform_indices = @transform_2, window_bounds = array<i64: 1, 32, 128>}, {transform_indices = @transform_3, window_bounds = array<i64: 1, 1, 128>}, {pipeline_mode = #tpu.pipeline_mode<synchronous>, transform_indices = @transform_4, window_bounds = array<i64: 32, 128>}]} {
    %c0_i32 = arith.constant 0 : i32
    %0 = arith.cmpi eq, %arg0, %c0_i32 : i32
    %1 = arith.extui %0 : i1 to i32
    %c0_i32_0 = arith.constant 0 : i32
    %2 = arith.cmpi ne, %1, %c0_i32_0 : i32
    scf.if %2 {
      %c0_14 = arith.constant 0 : index
      %c0_15 = arith.constant 0 : index
      %22 = vector.load %arg1[%c0_14, %c0_15] : memref<32x128xf32, #tpu.memory_space<vmem>>, vector<32x128xf32>
      %c0_16 = arith.constant 0 : index
      %c0_17 = arith.constant 0 : index
      %23 = vector.load %arg6[%c0_16, %c0_17] : memref<32x128xf32, #tpu.memory_space<vmem>>, vector<32x128xf32>
      tpu.vector_store %arg6[%c0_16, %c0_17], %22 {strides = array<i32>} : memref<32x128xf32, #tpu.memory_space<vmem>>, vector<32x128xf32>,
    } else {
    }
    %c0 = arith.constant 0 : index
    %c0_1 = arith.constant 0 : index
    %3 = vector.load %arg6[%c0, %c0_1] : memref<32x128xf32, #tpu.memory_space<vmem>>, vector<32x128xf32>
    %c0_2 = arith.constant 0 : index
    %c0_3 = arith.constant 0 : index
    %c0_4 = arith.constant 0 : index
    %4 = vector.load %arg3[%c0_2, %c0_3, %c0_4] : memref<1x32x128xbf16, #tpu.memory_space<vmem>>, vector<1x32x128xbf16>
    %5 = vector.shape_cast %4 : vector<1x32x128xbf16> to vector<32x128xbf16>
    %c0_5 = arith.constant 0 : index
    %c0_6 = arith.constant 0 : index
    %c0_7 = arith.constant 0 : index
    %6 = vector.load %arg4[%c0_5, %c0_6, %c0_7] : memref<1x1x128xf32, #tpu.memory_space<vmem>>, vector<1x1x128xf32>
    %7 = vector.shape_cast %6 : vector<1x1x128xf32> to vector<1x128xf32>
    %c0_8 = arith.constant 0 : index
    %c0_9 = arith.constant 0 : index
    %8 = vector.load %arg2[%c0_8, %c0_9] : memref<32x32xbf16, #tpu.memory_space<vmem>>, vector<32x32xbf16>
    %9 = vector.extract_strided_slice %3 {offsets = [0, 0], sizes = [32, 32], strides = [1, 1]} : vector<32x128xf32> to vector<32x32xf32>
    %10 = arith.truncf %9 : vector<32x32xf32> to vector<32x32xbf16>
    %cst = arith.constant dense<0.000000e+00> : vector<32x128xf32>
    %11 = tpu.matmul %10, %5, %cst {dimension_numbers = #tpu.dot_dimension_numbers<[1], [0], [0], [1], [0, 0, 1, 1], [], []>} : vector<32x32xbf16>, vector<32x128xbf16>, vector<32x128xf32> -> vector<32x128xf32>
    %12 = arith.truncf %11 : vector<32x128xf32> to vector<32x128xbf16>
    %cst_10 = arith.constant dense<0.000000e+00> : vector<32x128xf32>
    %13 = tpu.matmul %8, %12, %cst_10 {dimension_numbers = #tpu.dot_dimension_numbers<[1], [0], [0], [1], [0, 0, 1, 1], [], []>} : vector<32x32xbf16>, vector<32x128xbf16>, vector<32x128xf32> -> vector<32x128xf32>
    %14 = vector.broadcast %7 : vector<1x128xf32> to vector<32x128xf32>
    %15 = arith.addf %13, %14 : vector<32x128xf32>
    %c14_i32 = arith.constant 14 : i32
    %16 = arith.cmpi slt, %arg0, %c14_i32 : i32
    %17 = arith.extui %16 : i1 to i32
    %c0_i32_11 = arith.constant 0 : i32
    %18 = arith.cmpi ne, %17, %c0_i32_11 : i32
    scf.if %18 {
      %cst_14 = arith.constant 0.000000e+00 : f32
      %22 = vector.broadcast %cst_14 : f32 to vector<32x128xf32>
      %23 = arith.maximumf %15, %22 : vector<32x128xf32>
      %c0_15 = arith.constant 0 : index
      %c0_16 = arith.constant 0 : index
      %24 = vector.load %arg6[%c0_15, %c0_16] : memref<32x128xf32, #tpu.memory_space<vmem>>, vector<32x128xf32>
      tpu.vector_store %arg6[%c0_15, %c0_16], %23 {strides = array<i32>} : memref<32x128xf32, #tpu.memory_space<vmem>>, vector<32x128xf32>,
    } else {
    }
    %c14_i32_12 = arith.constant 14 : i32
    %19 = arith.cmpi eq, %arg0, %c14_i32_12 : i32
    %20 = arith.extui %19 : i1 to i32
    %c0_i32_13 = arith.constant 0 : i32
    %21 = arith.cmpi ne, %20, %c0_i32_13 : i32
    scf.if %21 {
      %22 = tpu.iota {dimensions = array<i32: 1>} : vector<32x128xi32>
      %c8_i32 = arith.constant 8 : i32
      %23 = vector.broadcast %c8_i32 : i32 to vector<32x128xi32>
      %24 = arith.cmpi slt, %22, %23 : vector<32x128xi32>
      %cst_14 = arith.constant -1.000000e+30 : f32
      %25 = vector.broadcast %cst_14 : f32 to vector<32x128xf32>
      %26 = arith.select %24, %15, %25 : vector<32x128xi1>, vector<32x128xf32>
      %cst_15 = arith.constant dense<0xFF800000> : vector<32xf32>
      %27 = vector.multi_reduction <maximumf>, %26, %cst_15 [1] : vector<32x128xf32> to vector<32xf32>
      %28 = vector.shape_cast %27 : vector<32xf32> to vector<32x1xf32>
      %29 = vector.broadcast %28 : vector<32x1xf32> to vector<32x128xf32>
      %30 = arith.subf %26, %29 : vector<32x128xf32>
      %31 = math.exp %30 : vector<32x128xf32>
      %cst_16 = arith.constant 0.000000e+00 : f32
      %32 = vector.broadcast %cst_16 : f32 to vector<32x128xf32>
      %33 = arith.select %24, %31, %32 : vector<32x128xi1>, vector<32x128xf32>
      %cst_17 = arith.constant dense<0.000000e+00> : vector<32xf32>
      %34 = vector.multi_reduction <add>, %33, %cst_17 [1] : vector<32x128xf32> to vector<32xf32>
      %35 = vector.shape_cast %34 : vector<32xf32> to vector<32x1xf32>
      %36 = math.log %35 : vector<32x1xf32>
      %37 = vector.broadcast %36 : vector<32x1xf32> to vector<32x128xf32>
      %38 = arith.subf %30, %37 : vector<32x128xf32>
      %cst_18 = arith.constant 0.000000e+00 : f32
      %39 = vector.broadcast %cst_18 : f32 to vector<32x128xf32>
      %40 = arith.select %24, %38, %39 : vector<32x128xi1>, vector<32x128xf32>
      %c0_19 = arith.constant 0 : index
      %c0_20 = arith.constant 0 : index
      %41 = vector.load %arg5[%c0_19, %c0_20] : memref<32x128xf32, #tpu.memory_space<vmem>>, vector<32x128xf32>
      tpu.vector_store %arg5[%c0_19, %c0_20], %40 {strides = array<i32>} : memref<32x128xf32, #tpu.memory_space<vmem>>, vector<32x128xf32>,
    } else {
    }
    return
  }
  func.func @transform_0(%arg0: i32) -> (i32, i32) {
    %c0_i32 = arith.constant 0 : i32
    %c0_i32_0 = arith.constant 0 : i32
    %c0_i32_1 = arith.constant 0 : i32
    return %c0_i32, %c0_i32_0 : i32, i32
  }
  func.func @transform_1(%arg0: i32) -> (i32, i32) {
    %c0_i32 = arith.constant 0 : i32
    %c0_i32_0 = arith.constant 0 : i32
    %c0_i32_1 = arith.constant 0 : i32
    return %c0_i32, %c0_i32_0 : i32, i32
  }
  func.func @transform_2(%arg0: i32) -> (i32, i32, i32) {
    %c0_i32 = arith.constant 0 : i32
    %c0_i32_0 = arith.constant 0 : i32
    %c0_i32_1 = arith.constant 0 : i32
    return %arg0, %c0_i32, %c0_i32_0 : i32, i32, i32
  }
  func.func @transform_3(%arg0: i32) -> (i32, i32, i32) {
    %c0_i32 = arith.constant 0 : i32
    %c0_i32_0 = arith.constant 0 : i32
    %c0_i32_1 = arith.constant 0 : i32
    return %arg0, %c0_i32, %c0_i32_0 : i32, i32, i32
  }
  func.func @transform_4(%arg0: i32) -> (i32, i32) {
    %c0_i32 = arith.constant 0 : i32
    %c0_i32_0 = arith.constant 0 : i32
    %c0_i32_1 = arith.constant 0 : i32
    return %c0_i32, %c0_i32_0 : i32, i32
  }
}

</mosaic_0001>

<bundles_post_ra>
// kernel: gcn15_forward.1
= control target key start
LH: loop header
LB: loop body
LE: loop exit
PB: predicated region body
PF: predicated region fallthrough
CT: control target
= control target key end

     0   :  { %9 = vsyncpa [#allocation4], 0  ;;  %s1166_s0 = inlined_call_operand.hbm [shape: f32[32,128], index: 0, kind: input, shape index: {}]   ;;  %s1167_s1 = inlined_call_operand.hbm [shape: bf16[32,32], index: 1, kind: input, shape index: {}]   ;;  %s1168_s2 = inlined_call_operand.hbm [shape: bf16[15,32,128], index: 2, kind: input, shape index: {}]   ;;  %s1169_s3 = inlined_call_operand.hbm [shape: f32[15,1,128], index: 3, kind: input, shape index: {}]   ;;  %s1170_s4 = inlined_call_operand.vmem [shape: f32[32,128], index: 4, kind: output, shape index: {}]  }
   0x1   :  { %10 = vsyncpa [#allocation6], 0  ;;  %s914_s15 = smov 0   ;;  %s916_s16 = smov 0  }
   0x2   :  { %s918_s17 = smov 0   ;;  %s920_s18 = smov 0  }
   0x3 LB: > { %s933_s19 = sadd.s32 4294967295, %s879_s18   ;;  %s936_s20 = sadd.s32 1, %s879_s18   ;;  %s879_s18 = sphi %s920_s18, %s1199_s18   ;;  %s875_s17 = sphi %s918_s17, %s1198_s17   ;;  %s871_s16 = sphi %s916_s16, %s1197_s16   ;;  %s867_s15 = sphi %s914_s15, %s1196_s15  }
   0x4   : > { %s62_s21 = ssub.s32 %s879_s18, %s936_s20  ;;  %s65_s22 = sadd.s32 1, %s875_s17 }
   0x5   : > { %p63_p0 = scmp.eq.s32.totalorder %s62_s21, 0  ;;  %p72_p1 = scmp.ne.s32.totalorder %s875_s17, %s871_s16 }
   0x6   : > { %p73_p2 = scmp.eq.s32.totalorder %s879_s18, 0  ;;  %p78_p3 = scmp.ne.s32.totalorder %s871_s16, %s867_s15 }
   0x7   : > { %s946_s23 = scalar_select %p63_p0, %s875_s17, %s65_s22  }
   0x8   : > { %p948_p4 = por %p73_p2, %p72_p1  ;;  %p1171_p5 = scmp.eq.s32.totalorder %s933_s19, 0 }
   0x9   : > { %p581_p6 = scmp.ge.s32.totalorder %s879_s18, 1  ;;  %p136_p7 = scmp.lt.s32.totalorder %s879_s18, 16 }
   0xa   : > { %p957_p8 = por %p1171_p5, %p78_p3  ;;  %s881_s27 = smov [#allocation3]  }
   0xb   : > { %p962_p10 = pnand %p581_p6, %p136_p7  ;;  %s148_s28 = sshll.u32 %s881_s27, 4  ;;  %s149_s28 = int_to_ptr.vmem [resolvable:$true] %s148_s28 }
   0xc   : > { %s1179_s25 = scalar_select %p957_p8, 1, 0 }
   0xd   : > { %s1180_s26 = scalar_select %p962_p10, 1, 0 }
   0xe   : > { %p644_p11 = pneg %p962_p10  ;;  %p660_p13 = scmp.lt.s32.totalorder %s879_s18, 15 }
   0xf   : > { %s721_s7 = scalar_lea.hbm %s1166_s0, 512 }
  0x10   : > { %p970_p12 = pnand %p644_p11, %p1171_p5  ;;  %p977_p0 = pnand %p660_p13, %p948_p4 }
  0x11   : > { %p722_p1 = scmp.ne.s32.totalorder %s1166_s0, %s721_s7  ;;  %p728_p4 = scmp.lt.u32.totalorder %s721_s7, %s1166_s0 }
  0x12   : > { %s1182_s30 = scalar_select %p977_p0, 1, 0 }
  0x13   : > { %p1175_p2 = pneg %p970_p12 }
  0x15   : > { %p724_p3 = pnand %p1175_p2, %p722_p1 }
  0x17   : > { %p725_p6 = pneg %p724_p3 }
  0x19   : > { %p730_p7 = pnand %p728_p4, %p725_p6 }
  0x1b   : > { %733 = shalt.err (!%p730_p7)
}
  0x1c   : > { %s734_s12 = scalar_lea.vmem %s149_s28, 512  ;;  %p742_p5 = scmp.lt.s32.totalorder %s149_s28, %s149_s28 }
  0x1d   : > { %p735_p11 = scmp.ne.s32.totalorder %s149_s28, %s734_s12  ;;  %p743_p8 = scmp.lt.s32.totalorder %s734_s12, %s734_s12 }
  0x1f   : > { %p737_p13 = pnand %p735_p11, %p1175_p2  ;;  %p744_p10 = por %p743_p8, %p742_p5 }
  0x21   : > { %p738_p9 = pneg %p737_p13 }
  0x23   : > { %p745_p0 = pnand %p744_p10, %p738_p9 }
  0x25   : > { %748 = shalt.err (!%p745_p0)
}
  0x26   : > { %s882_s13 = smov 128   ;;  %s883_s14 = smov 8  }
  0x27   : > { %647 = dma.hbm_to_vmem [thread:$0]  (!%p970_p12), %s1166_s0, 512, %s149_s28, [#allocation4], %s882_s13, %s882_s13, %s883_s14  }
  0x28   : > { %s175_s22 = sand.u32 1, %s879_s18   ;;  %s177_s24 = sand.u32 1, %s875_s17  }
  0x29   : > { %s585_s27 = sshll.u32 %s177_s24, 4  ;;  %s607_s5 = sshll.u32 %s879_s18, 8 }
  0x2a   : > { %s1011_s8 = scalar_lea.hbm %s1168_s2, %s607_s5  ;;  %s179_s9 = scalar_lea.vmem [#allocation7], %s585_s27 }
  0x2b   : > { %s186_s10 = sshll.u32 %s179_s9, 4  ;;  %s884_s11 = smov [#allocation5]   ;;  %s1013_s10 = int_to_ptr.vmem [resolvable:$true] %s186_s10 }
  0x2c   : > { %s1015_s28 = sshll.u32 %s884_s11, 4  ;;  %s1017_s12 = scalar_lea.sflag [#allocation4], %s175_s22  ;;  %s162_s28 = int_to_ptr.vmem [resolvable:$true] %s1015_s28 }
  0x2d   : > { %s749_s13 = scalar_lea.hbm %s1011_s8, 256  ;;  %p1183_p8 = scmp.ne.s32.totalorder %s1182_s30, 0 }
  0x2e   : > { %p750_p5 = scmp.ne.s32.totalorder %s1011_s8, %s749_s13  ;;  %s754_s21 = scalar_lea.hbm %s1168_s2, 3840 }
  0x2f   : > { %p1176_p9 = pneg %p1183_p8  ;;  %p755_p1 = scmp.lt.u32.totalorder %s1011_s8, %s1168_s2 }
  0x30   : > { %p756_p3 = scmp.lt.u32.totalorder %s754_s21, %s749_s13  ;;  %p758_p4 = scmp.lt.u32.totalorder %s749_s13, %s1011_s8 }
  0x31   : > { %p752_p10 = pnand %p1176_p9, %p750_p5 }
  0x32   : > { %p757_p6 = por %p756_p3, %p755_p1 }
  0x33   : > { %p753_p0 = pneg %p752_p10 }
  0x34   : > { %p759_p7 = por %p758_p4, %p757_p6 }
  0x36   : > { %p760_p11 = pnand %p759_p7, %p753_p0 }
  0x38   : > { %763 = shalt.err (!%p760_p11)
}
  0x39   : > { %s764_s22 = scalar_lea.vmem %s1013_s10, 256  ;;  %s885_s6 = smov [#allocation7]  }
  0x3a   : > { %p765_p13 = scmp.ne.s32.totalorder %s1013_s10, %s764_s22  ;;  %s769_s7 = sshll.u32 %s885_s6, 4  ;;  %s770_s7 = int_to_ptr.vmem [resolvable:$false] %s769_s7 }
  0x3b   : > { %s771_s9 = scalar_lea.vmem %s770_s7, 512  ;;  %p772_p2 = scmp.lt.s32.totalorder %s1013_s10, %s770_s7 }
  0x3c   : > { %p767_p5 = pnand %p765_p13, %p1176_p9  ;;  %p773_p1 = scmp.lt.s32.totalorder %s771_s9, %s764_s22 }
  0x3e   : > { %p768_p10 = pneg %p767_p5  ;;  %p774_p3 = por %p773_p1, %p772_p2 }
  0x40   : > { %p775_p6 = pnand %p774_p3, %p768_p10 }
  0x42   : > { %778 = shalt.err (!%p775_p6)
}
  0x43   : > { %s886_s11 = smov 64   ;;  %s887_s13 = smov 4  }
  0x44   : > { %654 = dma.hbm_to_vmem [thread:$0]  (!%p1183_p8), %s1011_s8, 256, %s1013_s10, %s1017_s12, %s886_s11, %s886_s11, %s887_s13  }
  0x45   : > { %s779_s21 = scalar_lea.hbm %s1167_s1, 256  ;;  %p1184_p0 = pneg %p970_p12 }
  0x46   : > { %p780_p2 = scmp.ne.s32.totalorder %s1167_s1, %s779_s21  ;;  %p786_p11 = scmp.lt.u32.totalorder %s779_s21, %s1167_s1 }
  0x48   : > { %p782_p4 = pnand %p780_p2, %p1184_p0 }
  0x4a   : > { %p783_p7 = pneg %p782_p4 }
  0x4c   : > { %p788_p13 = pnand %p786_p11, %p783_p7 }
  0x4e   : > { %791 = shalt.err (!%p788_p13)
}
  0x4f   : > { %s792_s8 = scalar_lea.vmem %s162_s28, 256  ;;  %p1185_p10 = pmov %p1184_p0 }
  0x50   : > { %p793_p5 = scmp.ne.s32.totalorder %s162_s28, %s792_s8  ;;  %p800_p6 = scmp.lt.s32.totalorder %s162_s28, %s162_s28 }
  0x51   : > { %p801_p9 = scmp.lt.s32.totalorder %s792_s8, %s792_s8 }
  0x52   : > { %p795_p1 = pnand %p793_p5, %p1185_p10 }
  0x53   : > { %p802_p8 = por %p801_p9, %p800_p6 }
  0x54   : > { %p796_p3 = pneg %p795_p1 }
  0x56   : > { %p803_p0 = pnand %p802_p8, %p796_p3 }
  0x58   : > { %806 = shalt.err (!%p803_p0)
}
  0x59   : > { %650 = dma.hbm_to_vmem [thread:$0]  (!%p970_p12), %s1167_s1, 256, %s162_s28, [#allocation6], %s886_s11, %s886_s11, %s887_s13  }
  0x5a   : > { %s588_s9 = sshll.u32 %s879_s18, 4  ;;  %s199_s14 = scalar_lea.vmem [#allocation8], %s177_s24 }
  0x5b   : > { %s206_s15 = sshll.u32 %s199_s14, 4  ;;  %s204_s5 = scalar_lea.hbm %s1169_s3, %s588_s9  ;;  %s207_s15 = int_to_ptr.vmem [resolvable:$true] %s206_s15 }
  0x5c   : > { %s807_s22 = scalar_lea.hbm %s204_s5, 16  ;;  %p1186_p9 = scmp.ne.s32.totalorder %s1182_s30, 0 }
  0x5d   : > { %p808_p8 = scmp.ne.s32.totalorder %s204_s5, %s807_s22  ;;  %s812_s8 = scalar_lea.hbm %s1169_s3, 240 }
  0x5e   : > { %p1187_p2 = pneg %p1186_p9  ;;  %p813_p12 = scmp.lt.u32.totalorder %s204_s5, %s1169_s3 }
  0x5f   : > { %p814_p11 = scmp.lt.u32.totalorder %s812_s8, %s807_s22  ;;  %p816_p5 = scmp.lt.u32.totalorder %s807_s22, %s204_s5 }
  0x60   : > { %p810_p4 = pnand %p808_p8, %p1187_p2 }
  0x61   : > { %p815_p13 = por %p814_p11, %p813_p12 }
  0x62   : > { %p811_p7 = pneg %p810_p4 }
  0x63   : > { %p817_p10 = por %p816_p5, %p815_p13 }
  0x65   : > { %p818_p1 = pnand %p817_p10, %p811_p7 }
  0x67   : > { %821 = shalt.err (!%p818_p1)
}
  0x68   : > { %s822_s24 = scalar_lea.vmem %s207_s15, 16  ;;  %p1188_p6 = pmov %p1187_p2 }
  0x69   : > { %p823_p3 = scmp.ne.s32.totalorder %s207_s15, %s822_s24  ;;  %s888_s11 = smov [#allocation8]  }
  0x6a   : > { %s827_s13 = sshll.u32 %s888_s11, 4  ;;  %s828_s13 = int_to_ptr.vmem [resolvable:$false] %s827_s13 }
  0x6b   : > { %p825_p0 = pnand %p823_p3, %p1188_p6  ;;  %s829_s10 = scalar_lea.vmem %s828_s13, 32 }
  0x6c   : > { %p830_p2 = scmp.lt.s32.totalorder %s207_s15, %s828_s13  ;;  %p831_p4 = scmp.lt.s32.totalorder %s829_s10, %s822_s24 }
  0x6d   : > { %p826_p8 = pneg %p825_p0 }
  0x6e   : > { %p832_p11 = por %p831_p4, %p830_p2 }
  0x70   : > { %p833_p12 = pnand %p832_p11, %p826_p8 }
  0x72   : > { %836 = shalt.err (!%p833_p12)
}
  0x73   : > { %657 = dma.hbm_to_vmem [thread:$0]  (!%p1186_p9), %s204_s5, 16, %s207_s15, %s1017_s12  }
  0x74   : > { %p1189_p7 = scmp.ne.s32.totalorder %s1180_s26, 0 }
  0x75   : > { %p1190_p13 = scmp.eq.s32.totalorder (!%p1189_p7), %s933_s19, 0 }
  0x76   : > { %215 = sbr.rel (%p1189_p7) target bundleno = 930 (0x3a2), region = 36 }
  0x7d   : > { %854 = dma.done.wait (%p1190_p13), [#allocation4], 512   ;;  %p1191_p5 = pmov %p1190_p13 }
  0x7f   : > { %856 = vsyncadd (%p1191_p5), [#allocation4], 4294966784  ;;  %p1192_p10 = pmov %p1191_p5 }
  0x80   : > { %p1193_p1 = pmov %p1191_p5 }
  0x81   : > { %858 = dma.done.wait (%p1192_p10), [#allocation6], 256  }
  0x82   : > { %860 = vsyncadd (%p1193_p1), [#allocation6], 4294967040  ;;  %s225_s30 = sand.u32 1, %s933_s19   ;;  %s227_s12 = sand.u32 1, %s871_s16  }
  0x83   : > { %s592_s7 = sshll.u32 %s227_s12, 4  ;;  %s226_s26 = scalar_lea.sflag [#allocation4], %s225_s30 }
  0x84   : > { %s229_s9 = scalar_lea.vmem [#allocation7], %s592_s7  ;;  %p1194_p9 = scmp.ne.s32.totalorder %s1179_s25, 0 }
  0x86   : > { %862 = dma.done.wait (%p1194_p9), %s226_s26, 272  }
  0x87   : > { %864 = vsyncadd (%p1194_p9), %s226_s26, 4294967024  ;;  %s1103_s14 = scalar_lea.vmem [#allocation8], %s227_s12  ;;  %p1195_p3 = scmp.ne.s32.totalorder %s933_s19, 0 }
  0x88   : > { %v266_v0 = vld [vmem:[#allocation3] sm:$0xff] (!%p1195_p3)  ;;  %v267_v1 = vld [vmem:[#allocation3 + $0x8] sm:$0xff] (!%p1195_p3)  ;;  %v268_v2 = vld [vmem:[#allocation3 + $0x10] sm:$0xff] (!%p1195_p3) }
  0x89   : > { %265 = sbr.rel (%p1195_p3) target bundleno = 144 (0x90), region = 56  ;;  %270 = vst [vmem:[#allocation2] sm:$0xff] (!%p1195_p3), %v266_v0  ;;  %271 = vst [vmem:[#allocation2 + $0x8] sm:$0xff] (!%p1195_p3), %v267_v1  ;;  %v269_v3 = vld [vmem:[#allocation3 + $0x18] sm:$0xff] (!%p1195_p3) }
  0x8a   : > { %272 = vst [vmem:[#allocation2 + $0x10] sm:$0xff] (!%p1195_p3), %v268_v2  ;;  %273 = vst [vmem:[#allocation2 + $0x18] sm:$0xff] (!%p1195_p3), %v269_v3 }
  0x90 PF: > { %v701_v4 = vld [vmem:[%s229_s9] sm:$0xff]   ;;  %v702_v5 = vld [vmem:[%s229_s9 + $0x8] sm:$0xff]   ;;  %vm301_vm0 = vcmask 261120   ;;  %p603_p6 = scmp.ge.s32.totalorder %s933_s19, 14 }
  0x91   : > { %616 = vmatprep.subr.bf16.mxu0 %v701_v4  ;;  %v274_v6 = vld [vmem:[#allocation2] sm:$0xff]  ;;  %v275_v7 = vld [vmem:[#allocation2 + $0x8] sm:$0xff]  ;;  %v276_v8 = vld [vmem:[#allocation2 + $0x10] sm:$0xff] }
  0x92   : > { %617 = vmatpush3.bf16.msra.mxu0 %v701_v4  ;;  %v287_v9 = vpack.c.bf16 %v275_v7, %v274_v6  ;;  %v277_v10 = vld [vmem:[#allocation2 + $0x18] sm:$0xff]  ;;  %v703_v12 = vld [vmem:[#allocation5] sm:$0xff]   ;;  %v704_v19 = vld [vmem:[#allocation5 + $0x8] sm:$0xff]  }
  0x93   : > { %618 = vmatprep.subr.bf16.mxu0 %v702_v5  ;;  %v288_v11 = vpack.c.bf16 %v277_v10, %v276_v8  ;;  %628 = vmatprep.mubr.msk.bf16.mxu1 %vm301_vm0, %v703_v12  ;;  %v598_v20 = vld [vmem:[%s1103_s14] ss:$0 sm:$0xff] }
  0x94   : > { %620 = vmatprep.mubr.msk.bf16.mxu0 %vm301_vm0, %v287_v9 }
  0x96   : > { %619 = vmatpush3.bf16.msra.mxu0 %v702_v5 }
  0x99   : > { %621 = vmatmul.mubr.msk.bf16.vlgmr.msra.gmra.mrb[0].mxu0 %vm301_vm0, %v288_v11 }
 0x16c   : > { %v622_v13 = vpop.f32.mrb[0].mxu0 }
 0x16d   : > { %v342_v14 = vpop.f32.mrb[1].mxu0 }
 0x16e   : > { %v623_v15 = vpop.f32.mrb[2].mxu0 }
 0x16f   : > { %v358_v16 = vpack.c.bf16 %v623_v15, %v622_v13  ;;  %v345_v17 = vpop.f32.mrb[3].mxu0 }
 0x170   : > { %v357_v18 = vpack.c.bf16 %v345_v17, %v342_v14 }
 0x172   : > { %624 = vmatprep.subr.bf16.mxu1 %v357_v18 }
 0x173   : > { %625 = vmatpush3.bf16.msra.mxu1 %v357_v18 }
 0x174   : > { %626 = vmatprep.subr.bf16.mxu1 %v358_v16 }
 0x177   : > { %627 = vmatpush3.bf16.msra.mxu1 %v358_v16 }
 0x17a   : > { %629 = vmatmul.mubr.msk.bf16.vlgmr.msra.gmra.mrb[0].mxu1 %vm301_vm0, %v704_v19 }
 0x24b   : > { %433 = sbr.rel (%p603_p6) target bundleno = 598 (0x256), region = 60 }
 0x24d   : > { %v630_v21 = vpop.f32.mrb[0].mxu1 }
 0x24e   : > { %v424_v22 = vadd.f32 %v630_v21, %v598_v20  ;;  %v415_v23 = vpop.f32.mrb[1].mxu1 }
 0x24f   : > { %v416_v24 = vadd.f32 %v598_v20, %v415_v23  ;;  %v631_v25 = vpop.f32.mrb[2].mxu1 }
 0x250   : > { %v427_v26 = vadd.f32 %v631_v25, %v598_v20  ;;  %v418_v27 = vpop.f32.mrb[3].mxu1  ;;  %v436_v31 = vmax.f32 (!%p603_p6), %v424_v22, 0.0 }
 0x251   : > { %v419_v28 = vadd.f32 %v598_v20, %v418_v27  ;;  %v434_v29 = vmax.f32 (!%p603_p6), %v416_v24, 0.0 }
 0x252   : > { %v437_v32 = vmax.f32 %v427_v26, 0.0  ;;  %440 = vst [vmem:[#allocation2 + $0x10] sm:$0xff] %v436_v31 }
 0x253   : > { %v435_v30 = vmax.f32 %v419_v28, 0.0  ;;  %438 = vst [vmem:[#allocation2] sm:$0xff] %v434_v29 }
 0x254   : > { %441 = vst [vmem:[#allocation2 + $0x18] sm:$0xff] %v437_v32 }
 0x255   : > { %439 = vst [vmem:[#allocation2 + $0x8] sm:$0xff] %v435_v30 }
 0x256 PF: > { %p604_p0 = scmp.ne.s32.totalorder %s933_s19, 14 }
 0x257   : > { %v446_v33 = vlaneseq (!%p604_p0) }
 0x258   : > { %445 = sbr.rel (%p604_p0) target bundleno = 930 (0x3a2), region = 64 }
 0x259   : > { %v1114_v34 = vand.u32 (!%p604_p0), 127, %v446_v33 }
 0x25b   : > { %vm448_vm1 = vcmp.lt.s32.totalorder (!%p604_p0), %v1114_v34, 8 }
 0x25c   : > { %v449_v35 = vsel (!%p604_p0), %vm448_vm1, %v416_v24, -1e+30  ;;  %v451_v36 = vsel (!%p604_p0), %vm448_vm1, %v424_v22, -1e+30  ;;  %v450_v37 = vsel (!%p604_p0), %vm448_vm1, %v419_v28, -1e+30 }
 0x25d   : > { %453 = vmax.xlane.f32.xlu0 (!%p604_p0), %v449_v35  ;;  %457 = vmax.xlane.f32.xlu1 (!%p604_p0), %v451_v36  ;;  %v452_v38 = vsel (!%p604_p0), %vm448_vm1, %v427_v26, -1e+30 }
 0x261   : > { %455 = vmax.xlane.f32.xlu0 %v450_v37  ;;  %459 = vmax.xlane.f32.xlu1 %v452_v38 }
 0x2ea   : > { %v454_v39 = vpop.xlane.xlu0 %453  ;;  %v458_v40 = vpop.xlane.xlu1 %457 }
 0x2eb   : > { %v461_v41 = vsub.f32 %v449_v35, %v454_v39  ;;  %v463_v42 = vsub.f32 %v451_v36, %v458_v40 }
 0x2ed   : > { %v465_v43 = vmul.f32 1.442695, %v461_v41  ;;  %v469_v44 = vmul.f32 1.442695, %v463_v42 }
 0x2ee   : > { %v456_v45 = vpop.xlane.xlu0 %455  ;;  %v460_v46 = vpop.xlane.xlu1 %459 }
 0x2ef   : > { %705 = vpow2.f32 %v465_v43  ;;  %v462_v47 = vsub.f32 %v450_v37, %v456_v45  ;;  %v464_v48 = vsub.f32 %v452_v38, %v460_v46 }
 0x2f0   : > { %707 = vpow2.f32 %v469_v44 }
 0x2f1   : > { %v467_v49 = vmul.f32 1.442695, %v462_v47  ;;  %v471_v50 = vmul.f32 1.442695, %v464_v48 }
 0x2f3   : > { %709 = vpow2.f32 %v467_v49 }
 0x2f4   : > { %711 = vpow2.f32 %v471_v50 }
 0x2f9   : > { %v706_v51 = vpop.eup %705 }
 0x2fa   : > { %v708_v52 = vpop.eup %707  ;;  %v473_v53 = vsel %vm448_vm1, %v706_v51, 0.0 }
 0x2fb   : > { %477 = vadd.xlane.f32.xlu0 %v473_v53  ;;  %v475_v54 = vsel %vm448_vm1, %v708_v52, 0.0 }
 0x2fd   : > { %v710_v55 = vpop.eup %709 }
 0x2fe   : > { %v712_v56 = vpop.eup %711  ;;  %v474_v57 = vsel %vm448_vm1, %v710_v55, 0.0 }
 0x2ff   : > { %481 = vadd.xlane.f32.xlu0 %v475_v54  ;;  %479 = vadd.xlane.f32.xlu1 %v474_v57  ;;  %v476_v58 = vsel %vm448_vm1, %v712_v56, 0.0 }
 0x303   : > { %483 = vadd.xlane.f32.xlu1 %v476_v58 }
 0x388   : > { %v478_v59 = vpop.xlane.xlu0 %477 }
 0x389   : > { %713 = vlog2.f32 %v478_v59 }
 0x38c   : > { %v480_v60 = vpop.xlane.xlu1 %479  ;;  %v482_v61 = vpop.xlane.xlu0 %481 }
 0x38d   : > { %715 = vlog2.f32 %v480_v60 }
 0x38e   : > { %717 = vlog2.f32 %v482_v61 }
 0x390   : > { %v484_v62 = vpop.xlane.xlu1 %483 }
 0x391   : > { %719 = vlog2.f32 %v484_v62 }
 0x393   : > { %v714_v63 = vpop.eup %713 }
 0x394   : > { %v486_v0 = vmul.f32 0.6931472, %v714_v63 }
 0x396   : > { %v493_v1 = vsub.f32 %v461_v41, %v486_v0 }
 0x397   : > { %v716_v2 = vpop.eup %715 }
 0x398   : > { %v718_v3 = vpop.eup %717  ;;  %v497_v4 = vsel %vm448_vm1, %v493_v1, 0.0  ;;  %v488_v5 = vmul.f32 0.6931472, %v716_v2 }
 0x399   : > { %501 = vst [vmem:[%s1170_s4] sm:$0xff] %v497_v4  ;;  %v490_v6 = vmul.f32 0.6931472, %v718_v3 }
 0x39a   : > { %v494_v7 = vsub.f32 %v462_v47, %v488_v5 }
 0x39b   : > { %v720_v8 = vpop.eup %719  ;;  %v495_v9 = vsub.f32 %v463_v42, %v490_v6 }
 0x39c   : > { %v498_v10 = vsel %vm448_vm1, %v494_v7, 0.0  ;;  %v492_v11 = vmul.f32 0.6931472, %v720_v8 }
 0x39d   : > { %502 = vst [vmem:[%s1170_s4 + $0x8] sm:$0xff] %v498_v10  ;;  %v499_v12 = vsel %vm448_vm1, %v495_v9, 0.0 }
 0x39e   : > { %503 = vst [vmem:[%s1170_s4 + $0x10] sm:$0xff] %v499_v12  ;;  %v496_v13 = vsub.f32 %v464_v48, %v492_v11 }
 0x3a0   : > { %v500_v14 = vsel %vm448_vm1, %v496_v13, 0.0 }
 0x3a1   : > { %504 = vst [vmem:[%s1170_s4 + $0x18] sm:$0xff] %v500_v14 }
 0x3a2 PF: > { %p13_p8 = scmp.ge.s32.totalorder %s936_s20, 17   ;;  %s1196_s15 = smov %s871_s16 }
 0x3a3   : > { %s1197_s16 = smov %s875_s17  ;;  %s1198_s17 = smov %s946_s23 }
 0x3a4   : > { %s1199_s18 = smov %s936_s20  ;;  %15 = sbr.rel (!%p13_p8) target bundleno = 3 (0x3), region = 102 }
 0x3ab   :  { %516 = vsyncpa [#allocation4], 1 }
 0x3ac   :  { %518 = vsyncpa [#allocation4 + $0x1], 1 }
 0x3ad   :  { %519 = vsyncpa [#allocation6], 1 }

</bundles_post_ra>
